<compile_context>
chip_gen: v7x
topology: tpu7x:2x2x1
jax: 0.10.0
libtpu: 0.0.40
codegen_flags: <defaults>
</compile_context>

<pallas_src>
import functools

import jax
import jax.numpy as jnp
import numpy as np
from jax.experimental import pallas as pl
from jax.experimental.pallas import tpu as pltpu


def _gat_kernel(feat_all_ref, feat_dst_ref, wsrc_ref, wdst_ref, bias_ref,
                out_ref, *, num_heads, out_feats, negative_slope, mxu_dtype,
                approx_reciprocal):
    """One destination-node tile per grid step, all heads fused.

    feat_all_ref : (N_src, F_in)        all node features (shared across tiles)
    feat_dst_ref : (T_dst, F_in)        this tile's destination-node features
    wsrc_ref     : (F_in, H*D + H)      packed [W_fs | wl]  (pre-transposed)
    wdst_ref     : (F_in, H)            wr (folded right attention weights)
    bias_ref     : (T_dst, N_src)       dst-major additive mask (0 / -1e30)
    out_ref      : (T_dst, H*D)         lane-dense fused-head output
    """
    H, D = num_heads, out_feats

    x_all = feat_all_ref[...].astype(mxu_dtype)     # (N_src, F_in)
    x_dst = feat_dst_ref[...].astype(mxu_dtype)     # (T_dst, F_in)
    w_src = wsrc_ref[...].astype(mxu_dtype)         # (F_in, H*D + H)
    w_dst = wdst_ref[...].astype(mxu_dtype)         # (F_in, H)

    # One fat MXU matmul: projected source features for all heads + folded el.
    proj = jnp.dot(x_all, w_src, preferred_element_type=jnp.float32)  # (N_src, H*D+H)
    fs = proj[:, :H * D]                                              # (N_src, H*D), f32
    fs_m = fs.astype(mxu_dtype)
    # Folded right logits for this destination tile.
    er = jnp.dot(x_dst, w_dst, preferred_element_type=jnp.float32)    # (T_dst, H)

    bias = bias_ref[...].astype(jnp.float32)        # (T_dst, N_src): 0 or -1e30

    outs = []
    for h in range(H):                              # H is small and static
        el_col = proj[:, H * D + h:H * D + h + 1]   # (N_src, 1)
        el_row = jnp.transpose(el_col)              # (1, N_src) — tiny XLU move
        # Dst-major edge logits: e[v, u] = leaky_relu(el[u] + er[v]) + bias[v,u]
        e = er[:, h:h + 1] + el_row                 # (T_dst, N_src)
        e = jnp.where(e > 0, e, negative_slope * e)
        e = e + bias
        # edge_softmax over incoming edges (lane-minor axis); masked entries
        # underflow to exactly 0 after exp, self loops guarantee denom > 0.
        m = jnp.max(e, axis=-1, keepdims=True)      # (T_dst, 1)
        p = jnp.exp(e - m)
        denom = jnp.sum(p, axis=-1, keepdims=True)  # (T_dst, 1)
        a = p * pl.reciprocal(denom, approx=approx_reciprocal)
        # Aggregation: plain MXU matmul (no transposed operand).
        outs.append(jnp.dot(a.astype(mxu_dtype), fs_m[:, h * D:(h + 1) * D],
                            preferred_element_type=jnp.float32))

    out_ref[...] = jnp.concatenate(outs, axis=-1).astype(out_ref.dtype)


def gat_conv_forward(feat, adj, fc_weight, attn_l, attn_r, *,
                     negative_slope=0.2, tile_dst=None,
                     mxu_dtype=jnp.bfloat16, approx_reciprocal=True):
    """GATConv forward.

    feat      : (N, F_in)        node features
    adj       : (N, N)           adj[u, v] != 0 iff edge u -> v (self loops added)
    fc_weight : (H*D, F_in)      nn.Linear weight (row h*D+d)
    attn_l/r  : (1, H, D)        attention parameters
    Returns (N, H, D), matching the PyTorch/DGL module output.
    """
    N, F_in = feat.shape
    HD = fc_weight.shape[0]
    H, D = attn_l.shape[1], attn_l.shape[2]
    assert HD == H * D

    if tile_dst is None:
        tile_dst = 128 if N % 128 == 0 else N
    assert N % tile_dst == 0, "TODO(synk): ragged destination tiling"
    n_tiles = N // tile_dst

    # ---- wrapper-side layout plumbing (done once, outside the hot loop) ----
    # Packed source-side matmul matrix: [W_fs | wl], pre-transposed so the
    # kernel does a straight (N, F_in) @ (F_in, H*D + H) MXU matmul.
    w_fs = jnp.transpose(fc_weight)                         # (F_in, H*D)
    w3 = fc_weight.reshape(H, D, F_in)
    wl = jnp.einsum("hdf,hd->fh", w3, attn_l[0])            # (F_in, H)
    wr = jnp.einsum("hdf,hd->fh", w3, attn_r[0])            # (F_in, H)
    w_src = jnp.concatenate([w_fs, wl], axis=1)             # (F_in, H*D + H)
    w_dst = wr                                              # (F_in, H)

    # Dst-major additive mask bias (bf16 halves the dominant HBM traffic).
    bias = jnp.where(jnp.transpose(adj) > 0, 0.0, -1e30).astype(jnp.bfloat16)

    out_flat = pl.pallas_call(
        functools.partial(_gat_kernel, num_heads=H, out_feats=D,
                          negative_slope=negative_slope,
                          mxu_dtype=mxu_dtype,
                          approx_reciprocal=approx_reciprocal),
        out_shape=jax.ShapeDtypeStruct((N, HD), jnp.float32),
        grid_spec=pltpu.PrefetchScalarGridSpec(
            num_scalar_prefetch=0,
            grid=(n_tiles,),
            in_specs=[
                pl.BlockSpec((N, F_in), lambda i: (0, 0)),          # feat (all src)
                pl.BlockSpec((tile_dst, F_in), lambda i: (i, 0)),   # feat (dst tile)
                pl.BlockSpec((F_in, HD + H), lambda i: (0, 0)),     # [W_fs | wl]
                pl.BlockSpec((F_in, H), lambda i: (0, 0)),          # wr
                pl.BlockSpec((tile_dst, N), lambda i: (i, 0)),      # additive mask
            ],
            out_specs=pl.BlockSpec((tile_dst, HD), lambda i: (i, 0)),
        ),
        compiler_params=pltpu.CompilerParams(
            dimension_semantics=("parallel",)),
    )(feat, feat, w_src, w_dst, bias)

    return out_flat.reshape(N, H, D)        # pure reshape, no transpose


def _reference(feat, adj, fc_weight, attn_l, attn_r, negative_slope=0.2):
    """Pure-JAX reference of the same forward pass (for verification)."""
    N, F_in = feat.shape
    H, D = attn_l.shape[1], attn_l.shape[2]
    fs = (feat @ fc_weight.T).reshape(N, H, D)                 # (N, H, D)
    el = jnp.sum(fs * attn_l, axis=-1)                         # (N, H)
    er = jnp.sum(fs * attn_r, axis=-1)                         # (N, H)
    e = el[:, None, :] + er[None, :, :]                        # (Nsrc, Ndst, H)
    e = jnp.where(e > 0, e, negative_slope * e)
    mask = (adj > 0)[:, :, None]
    e = jnp.where(mask, e, -1e30)
    m = jnp.max(e, axis=0, keepdims=True)
    p = jnp.where(mask, jnp.exp(e - m), 0.0)
    a = p / jnp.sum(p, axis=0, keepdims=True)
    return jnp.einsum("uvh,uhd->vhd", a, fs)                   # (N, H, D)


if __name__ == "__main__":
    # Small synthetic problem: 64 nodes, 32 input feats, 4 heads, 16 out feats.
    N, F_IN, H, D = 64, 32, 4, 16
    NEG_SLOPE = 0.2

    key = jax.random.PRNGKey(0)
    k_feat, k_adj, k_w, k_al, k_ar = jax.random.split(key, 5)

    feat = jax.random.normal(k_feat, (N, F_IN), dtype=jnp.float32)

    # Random directed graph + self loops (guarantees in-degree >= 1).
    adj = (jax.random.uniform(k_adj, (N, N)) < 0.25).astype(jnp.float32)
    adj = jnp.maximum(adj, jnp.eye(N, dtype=jnp.float32))

    # Deterministic Xavier-normal-style init (gain = sqrt(2), 'relu' gain).
    gain = float(np.sqrt(2.0))
    std_fc = gain * float(np.sqrt(2.0 / (F_IN + H * D)))
    fc_weight = std_fc * jax.random.normal(k_w, (H * D, F_IN), dtype=jnp.float32)
    std_attn = gain * float(np.sqrt(2.0 / (H * D + D)))
    attn_l = std_attn * jax.random.normal(k_al, (1, H, D), dtype=jnp.float32)
    attn_r = std_attn * jax.random.normal(k_ar, (1, H, D), dtype=jnp.float32)

    ref = _reference(feat, adj, fc_weight, attn_l, attn_r, NEG_SLOPE)

    # 1) Full-precision variant: tight check against the pure-JAX reference.
    out_f32 = gat_conv_forward(feat, adj, fc_weight, attn_l, attn_r,
                               negative_slope=NEG_SLOPE, tile_dst=32,
                               mxu_dtype=jnp.float32, approx_reciprocal=False)
    out_f32 = jax.block_until_ready(out_f32)
    np.testing.assert_allclose(np.asarray(out_f32), np.asarray(ref),
                               rtol=1e-4, atol=1e-4)

    # 2) Performance variant (default: bf16 MXU operands + EUP approx recip).
    out_bf16 = gat_conv_forward(feat, adj, fc_weight, attn_l, attn_r,
                                negative_slope=NEG_SLOPE, tile_dst=32)
    out_bf16 = jax.block_until_ready(out_bf16)
    rel = (np.linalg.norm(np.asarray(out_bf16) - np.asarray(ref)) /
           np.linalg.norm(np.asarray(ref)))
    assert rel < 5e-2, f"bf16 variant relative error too large: {rel}"

    print("KERNEL_OK")
</pallas_src>

<mosaic_0001>
module attributes {stable_mosaic.version = 11 : i64} {
  func.func @_gat_kernel(%arg0: i32, %arg1: memref<64x32xf32, #tpu.memory_space<vmem>>, %arg2: memref<32x32xf32, #tpu.memory_space<vmem>>, %arg3: memref<32x68xf32, #tpu.memory_space<vmem>>, %arg4: memref<32x4xf32, #tpu.memory_space<vmem>>, %arg5: memref<32x64xbf16, #tpu.memory_space<vmem>>, %arg6: memref<32x64xf32, #tpu.memory_space<vmem>>) attributes {dimension_semantics = [#tpu.dimension_semantics<parallel>], iteration_bounds = array<i64: 2>, scalar_prefetch = 0 : i64, scratch_operands = 0 : i64, tpu.core_type = #tpu.core_type<tc>, window_params = [{pipeline_mode = #tpu.pipeline_mode<synchronous>, transform_indices = @transform_0, window_bounds = array<i64: 64, 32>}, {transform_indices = @transform_1, window_bounds = array<i64: 32, 32>}, {pipeline_mode = #tpu.pipeline_mode<synchronous>, transform_indices = @transform_2, window_bounds = array<i64: 32, 68>}, {pipeline_mode = #tpu.pipeline_mode<synchronous>, transform_indices = @transform_3, window_bounds = array<i64: 32, 4>}, {transform_indices = @transform_4, window_bounds = array<i64: 32, 64>}, {transform_indices = @transform_5, window_bounds = array<i64: 32, 64>}]} {
    %c0 = arith.constant 0 : index
    %c0_0 = arith.constant 0 : index
    %0 = vector.load %arg1[%c0, %c0_0] : memref<64x32xf32, #tpu.memory_space<vmem>>, vector<64x32xf32>
    %c0_1 = arith.constant 0 : index
    %c0_2 = arith.constant 0 : index
    %1 = vector.load %arg2[%c0_1, %c0_2] : memref<32x32xf32, #tpu.memory_space<vmem>>, vector<32x32xf32>
    %c0_3 = arith.constant 0 : index
    %c0_4 = arith.constant 0 : index
    %2 = vector.load %arg3[%c0_3, %c0_4] : memref<32x68xf32, #tpu.memory_space<vmem>>, vector<32x68xf32>
    %c0_5 = arith.constant 0 : index
    %c0_6 = arith.constant 0 : index
    %3 = vector.load %arg4[%c0_5, %c0_6] : memref<32x4xf32, #tpu.memory_space<vmem>>, vector<32x4xf32>
    %cst = arith.constant dense<0.000000e+00> : vector<64x68xf32>
    %4 = tpu.matmul %0, %2, %cst {dimension_numbers = #tpu.dot_dimension_numbers<[1], [0], [0], [1], [0, 0, 1, 1], [], []>} : vector<64x32xf32>, vector<32x68xf32>, vector<64x68xf32> -> vector<64x68xf32>
    %5 = vector.extract_strided_slice %4 {offsets = [0, 0], sizes = [64, 64], strides = [1, 1]} : vector<64x68xf32> to vector<64x64xf32>
    %cst_7 = arith.constant dense<0.000000e+00> : vector<32x4xf32>
    %6 = tpu.matmul %1, %3, %cst_7 {dimension_numbers = #tpu.dot_dimension_numbers<[1], [0], [0], [1], [0, 0, 1, 1], [], []>} : vector<32x32xf32>, vector<32x4xf32>, vector<32x4xf32> -> vector<32x4xf32>
    %c0_8 = arith.constant 0 : index
    %c0_9 = arith.constant 0 : index
    %7 = vector.load %arg5[%c0_8, %c0_9] : memref<32x64xbf16, #tpu.memory_space<vmem>>, vector<32x64xbf16>
    %8 = arith.extf %7 : vector<32x64xbf16> to vector<32x64xf32>
    %9 = vector.extract_strided_slice %4 {offsets = [0, 64], sizes = [64, 1], strides = [1, 1]} : vector<64x68xf32> to vector<64x1xf32>
    %10 = tpu.transpose %9, [1, 0] : vector<64x1xf32> -> vector<1x64xf32>
    %11 = vector.extract_strided_slice %6 {offsets = [0, 0], sizes = [32, 1], strides = [1, 1]} : vector<32x4xf32> to vector<32x1xf32>
    %12 = vector.broadcast %11 : vector<32x1xf32> to vector<32x64xf32>
    %13 = vector.broadcast %10 : vector<1x64xf32> to vector<32x64xf32>
    %14 = arith.addf %12, %13 : vector<32x64xf32>
    %cst_10 = arith.constant 0.000000e+00 : f32
    %15 = vector.broadcast %cst_10 : f32 to vector<32x64xf32>
    %16 = arith.cmpf ogt, %14, %15 : vector<32x64xf32>
    %cst_11 = arith.constant 2.000000e-01 : f32
    %17 = vector.broadcast %cst_11 : f32 to vector<32x64xf32>
    %18 = arith.mulf %17, %14 : vector<32x64xf32>
    %19 = arith.select %16, %14, %18 : vector<32x64xi1>, vector<32x64xf32>
    %20 = arith.addf %19, %8 : vector<32x64xf32>
    %cst_12 = arith.constant dense<0xFF800000> : vector<32xf32>
    %21 = vector.multi_reduction <maximumf>, %20, %cst_12 [1] : vector<32x64xf32> to vector<32xf32>
    %22 = vector.shape_cast %21 : vector<32xf32> to vector<32x1xf32>
    %23 = vector.broadcast %22 : vector<32x1xf32> to vector<32x64xf32>
    %24 = arith.subf %20, %23 : vector<32x64xf32>
    %25 = math.exp %24 : vector<32x64xf32>
    %cst_13 = arith.constant dense<0.000000e+00> : vector<32xf32>
    %26 = vector.multi_reduction <add>, %25, %cst_13 [1] : vector<32x64xf32> to vector<32xf32>
    %27 = vector.shape_cast %26 : vector<32xf32> to vector<32x1xf32>
    %28 = tpu.reciprocal %27 : vector<32x1xf32> -> vector<32x1xf32>
    %29 = vector.broadcast %28 : vector<32x1xf32> to vector<32x64xf32>
    %30 = arith.mulf %25, %29 : vector<32x64xf32>
    %31 = vector.extract_strided_slice %5 {offsets = [0, 0], sizes = [64, 16], strides = [1, 1]} : vector<64x64xf32> to vector<64x16xf32>
    %cst_14 = arith.constant dense<0.000000e+00> : vector<32x16xf32>
    %32 = tpu.matmul %30, %31, %cst_14 {dimension_numbers = #tpu.dot_dimension_numbers<[1], [0], [0], [1], [0, 0, 1, 1], [], []>} : vector<32x64xf32>, vector<64x16xf32>, vector<32x16xf32> -> vector<32x16xf32>
    %33 = vector.extract_strided_slice %4 {offsets = [0, 65], sizes = [64, 1], strides = [1, 1]} : vector<64x68xf32> to vector<64x1xf32>
    %34 = tpu.transpose %33, [1, 0] : vector<64x1xf32> -> vector<1x64xf32>
    %35 = vector.extract_strided_slice %6 {offsets = [0, 1], sizes = [32, 1], strides = [1, 1]} : vector<32x4xf32> to vector<32x1xf32>
    %36 = vector.broadcast %35 : vector<32x1xf32> to vector<32x64xf32>
    %37 = vector.broadcast %34 : vector<1x64xf32> to vector<32x64xf32>
    %38 = arith.addf %36, %37 : vector<32x64xf32>
    %cst_15 = arith.constant 0.000000e+00 : f32
    %39 = vector.broadcast %cst_15 : f32 to vector<32x64xf32>
    %40 = arith.cmpf ogt, %38, %39 : vector<32x64xf32>
    %cst_16 = arith.constant 2.000000e-01 : f32
    %41 = vector.broadcast %cst_16 : f32 to vector<32x64xf32>
    %42 = arith.mulf %41, %38 : vector<32x64xf32>
    %43 = arith.select %40, %38, %42 : vector<32x64xi1>, vector<32x64xf32>
    %44 = arith.addf %43, %8 : vector<32x64xf32>
    %cst_17 = arith.constant dense<0xFF800000> : vector<32xf32>
    %45 = vector.multi_reduction <maximumf>, %44, %cst_17 [1] : vector<32x64xf32> to vector<32xf32>
    %46 = vector.shape_cast %45 : vector<32xf32> to vector<32x1xf32>
    %47 = vector.broadcast %46 : vector<32x1xf32> to vector<32x64xf32>
    %48 = arith.subf %44, %47 : vector<32x64xf32>
    %49 = math.exp %48 : vector<32x64xf32>
    %cst_18 = arith.constant dense<0.000000e+00> : vector<32xf32>
    %50 = vector.multi_reduction <add>, %49, %cst_18 [1] : vector<32x64xf32> to vector<32xf32>
    %51 = vector.shape_cast %50 : vector<32xf32> to vector<32x1xf32>
    %52 = tpu.reciprocal %51 : vector<32x1xf32> -> vector<32x1xf32>
    %53 = vector.broadcast %52 : vector<32x1xf32> to vector<32x64xf32>
    %54 = arith.mulf %49, %53 : vector<32x64xf32>
    %55 = vector.extract_strided_slice %5 {offsets = [0, 16], sizes = [64, 16], strides = [1, 1]} : vector<64x64xf32> to vector<64x16xf32>
    %cst_19 = arith.constant dense<0.000000e+00> : vector<32x16xf32>
    %56 = tpu.matmul %54, %55, %cst_19 {dimension_numbers = #tpu.dot_dimension_numbers<[1], [0], [0], [1], [0, 0, 1, 1], [], []>} : vector<32x64xf32>, vector<64x16xf32>, vector<32x16xf32> -> vector<32x16xf32>
    %57 = vector.extract_strided_slice %4 {offsets = [0, 66], sizes = [64, 1], strides = [1, 1]} : vector<64x68xf32> to vector<64x1xf32>
    %58 = tpu.transpose %57, [1, 0] : vector<64x1xf32> -> vector<1x64xf32>
    %59 = vector.extract_strided_slice %6 {offsets = [0, 2], sizes = [32, 1], strides = [1, 1]} : vector<32x4xf32> to vector<32x1xf32>
    %60 = vector.broadcast %59 : vector<32x1xf32> to vector<32x64xf32>
    %61 = vector.broadcast %58 : vector<1x64xf32> to vector<32x64xf32>
    %62 = arith.addf %60, %61 : vector<32x64xf32>
    %cst_20 = arith.constant 0.000000e+00 : f32
    %63 = vector.broadcast %cst_20 : f32 to vector<32x64xf32>
    %64 = arith.cmpf ogt, %62, %63 : vector<32x64xf32>
    %cst_21 = arith.constant 2.000000e-01 : f32
    %65 = vector.broadcast %cst_21 : f32 to vector<32x64xf32>
    %66 = arith.mulf %65, %62 : vector<32x64xf32>
    %67 = arith.select %64, %62, %66 : vector<32x64xi1>, vector<32x64xf32>
    %68 = arith.addf %67, %8 : vector<32x64xf32>
    %cst_22 = arith.constant dense<0xFF800000> : vector<32xf32>
    %69 = vector.multi_reduction <maximumf>, %68, %cst_22 [1] : vector<32x64xf32> to vector<32xf32>
    %70 = vector.shape_cast %69 : vector<32xf32> to vector<32x1xf32>
    %71 = vector.broadcast %70 : vector<32x1xf32> to vector<32x64xf32>
    %72 = arith.subf %68, %71 : vector<32x64xf32>
    %73 = math.exp %72 : vector<32x64xf32>
    %cst_23 = arith.constant dense<0.000000e+00> : vector<32xf32>
    %74 = vector.multi_reduction <add>, %73, %cst_23 [1] : vector<32x64xf32> to vector<32xf32>
    %75 = vector.shape_cast %74 : vector<32xf32> to vector<32x1xf32>
    %76 = tpu.reciprocal %75 : vector<32x1xf32> -> vector<32x1xf32>
    %77 = vector.broadcast %76 : vector<32x1xf32> to vector<32x64xf32>
    %78 = arith.mulf %73, %77 : vector<32x64xf32>
    %79 = vector.extract_strided_slice %5 {offsets = [0, 32], sizes = [64, 16], strides = [1, 1]} : vector<64x64xf32> to vector<64x16xf32>
    %cst_24 = arith.constant dense<0.000000e+00> : vector<32x16xf32>
    %80 = tpu.matmul %78, %79, %cst_24 {dimension_numbers = #tpu.dot_dimension_numbers<[1], [0], [0], [1], [0, 0, 1, 1], [], []>} : vector<32x64xf32>, vector<64x16xf32>, vector<32x16xf32> -> vector<32x16xf32>
    %81 = vector.extract_strided_slice %4 {offsets = [0, 67], sizes = [64, 1], strides = [1, 1]} : vector<64x68xf32> to vector<64x1xf32>
    %82 = tpu.transpose %81, [1, 0] : vector<64x1xf32> -> vector<1x64xf32>
    %83 = vector.extract_strided_slice %6 {offsets = [0, 3], sizes = [32, 1], strides = [1, 1]} : vector<32x4xf32> to vector<32x1xf32>
    %84 = vector.broadcast %83 : vector<32x1xf32> to vector<32x64xf32>
    %85 = vector.broadcast %82 : vector<1x64xf32> to vector<32x64xf32>
    %86 = arith.addf %84, %85 : vector<32x64xf32>
    %cst_25 = arith.constant 0.000000e+00 : f32
    %87 = vector.broadcast %cst_25 : f32 to vector<32x64xf32>
    %88 = arith.cmpf ogt, %86, %87 : vector<32x64xf32>
    %cst_26 = arith.constant 2.000000e-01 : f32
    %89 = vector.broadcast %cst_26 : f32 to vector<32x64xf32>
    %90 = arith.mulf %89, %86 : vector<32x64xf32>
    %91 = arith.select %88, %86, %90 : vector<32x64xi1>, vector<32x64xf32>
    %92 = arith.addf %91, %8 : vector<32x64xf32>
    %cst_27 = arith.constant dense<0xFF800000> : vector<32xf32>
    %93 = vector.multi_reduction <maximumf>, %92, %cst_27 [1] : vector<32x64xf32> to vector<32xf32>
    %94 = vector.shape_cast %93 : vector<32xf32> to vector<32x1xf32>
    %95 = vector.broadcast %94 : vector<32x1xf32> to vector<32x64xf32>
    %96 = arith.subf %92, %95 : vector<32x64xf32>
    %97 = math.exp %96 : vector<32x64xf32>
    %cst_28 = arith.constant dense<0.000000e+00> : vector<32xf32>
    %98 = vector.multi_reduction <add>, %97, %cst_28 [1] : vector<32x64xf32> to vector<32xf32>
    %99 = vector.shape_cast %98 : vector<32xf32> to vector<32x1xf32>
    %100 = tpu.reciprocal %99 : vector<32x1xf32> -> vector<32x1xf32>
    %101 = vector.broadcast %100 : vector<32x1xf32> to vector<32x64xf32>
    %102 = arith.mulf %97, %101 : vector<32x64xf32>
    %103 = vector.extract_strided_slice %5 {offsets = [0, 48], sizes = [64, 16], strides = [1, 1]} : vector<64x64xf32> to vector<64x16xf32>
    %cst_29 = arith.constant dense<0.000000e+00> : vector<32x16xf32>
    %104 = tpu.matmul %102, %103, %cst_29 {dimension_numbers = #tpu.dot_dimension_numbers<[1], [0], [0], [1], [0, 0, 1, 1], [], []>} : vector<32x64xf32>, vector<64x16xf32>, vector<32x16xf32> -> vector<32x16xf32>
    %105 = tpu.concatenate %32, %56, %80, %104 in 1 : vector<32x16xf32>, vector<32x16xf32>, vector<32x16xf32>, vector<32x16xf32> -> vector<32x64xf32>
    %c0_30 = arith.constant 0 : index
    %c0_31 = arith.constant 0 : index
    %106 = vector.load %arg6[%c0_30, %c0_31] : memref<32x64xf32, #tpu.memory_space<vmem>>, vector<32x64xf32>
    tpu.vector_store %arg6[%c0_30, %c0_31], %105 {strides = array<i32>} : memref<32x64xf32, #tpu.memory_space<vmem>>, vector<32x64xf32>,
    return
  }
  func.func @transform_0(%arg0: i32) -> (i32, i32) {
    %c0_i32 = arith.constant 0 : i32
    %c0_i32_0 = arith.constant 0 : i32
    %c0_i32_1 = arith.constant 0 : i32
    return %c0_i32, %c0_i32_0 : i32, i32
  }
  func.func @transform_1(%arg0: i32) -> (i32, i32) {
    %c0_i32 = arith.constant 0 : i32
    %c0_i32_0 = arith.constant 0 : i32
    return %arg0, %c0_i32 : i32, i32
  }
  func.func @transform_2(%arg0: i32) -> (i32, i32) {
    %c0_i32 = arith.constant 0 : i32
    %c0_i32_0 = arith.constant 0 : i32
    %c0_i32_1 = arith.constant 0 : i32
    return %c0_i32, %c0_i32_0 : i32, i32
  }
  func.func @transform_3(%arg0: i32) -> (i32, i32) {
    %c0_i32 = arith.constant 0 : i32
    %c0_i32_0 = arith.constant 0 : i32
    %c0_i32_1 = arith.constant 0 : i32
    return %c0_i32, %c0_i32_0 : i32, i32
  }
  func.func @transform_4(%arg0: i32) -> (i32, i32) {
    %c0_i32 = arith.constant 0 : i32
    %c0_i32_0 = arith.constant 0 : i32
    return %arg0, %c0_i32 : i32, i32
  }
  func.func @transform_5(%arg0: i32) -> (i32, i32) {
    %c0_i32 = arith.constant 0 : i32
    %c0_i32_0 = arith.constant 0 : i32
    return %arg0, %c0_i32 : i32, i32
  }
}

</mosaic_0001>

<bundles_post_ra>
// kernel: tpu_custom_call.1
= control target key start
LH: loop header
LB: loop body
LE: loop exit
PB: predicated region body
PF: predicated region fallthrough
CT: control target
= control target key end

     0   :  { %10 = vsyncpa [#allocation3], 0  ;;  %s2888_s0 = inlined_call_operand.vmem [shape: f32[64,32], index: 0, kind: input, shape index: {}]   ;;  %s2889_s1 = inlined_call_operand.vmem [shape: f32[64,32], index: 1, kind: input, shape index: {}]   ;;  %s2890_s2 = inlined_call_operand.vmem [shape: f32[32,68], index: 2, kind: input, shape index: {}]   ;;  %s2891_s3 = inlined_call_operand.vmem [shape: f32[32,4], index: 3, kind: input, shape index: {}]   ;;  %s2892_s4 = inlined_call_operand.vmem [shape: bf16[64,64], index: 4, kind: input, shape index: {}]   ;;  %s2893_s5 = inlined_call_operand.hbm [shape: f32[64,64], index: 5, kind: output, shape index: {}]  }
   0x1   :  { %12 = vsyncpa [#allocation3 + $0x1], 0  ;;  %s2319_s18 = smov 0   ;;  %s2321_s19 = smov 0  }
   0x2   :  { %s2323_s20 = smov 0   ;;  %s2325_s21 = smov 0  }
   0x3 LB: > { %s2340_s22 = sadd.s32 4294967295, %s2270_s21   ;;  %s1690_s23 = sadd.s32 4294967294, %s2270_s21   ;;  %s2270_s21 = sphi %s2325_s21, %s2899_s21   ;;  %s2266_s20 = sphi %s2323_s20, %s2898_s20   ;;  %s2262_s19 = sphi %s2321_s19, %s2897_s19   ;;  %s2258_s18 = sphi %s2319_s18, %s2896_s18  }
   0x4   : > { %s2344_s24 = sadd.s32 1, %s2270_s21   ;;  %s140_s25 = sadd.s32 1, %s2266_s20 }
   0x5   : > { %s137_s26 = ssub.s32 %s2270_s21, %s2344_s24  ;;  %p150_p0 = scmp.ne.s32.totalorder %s2266_s20, %s2262_s19 }
   0x6   : > { %p138_p1 = scmp.eq.s32.totalorder %s137_s26, 0  ;;  %p151_p2 = scmp.eq.s32.totalorder %s2340_s22, 1 }
   0x7   : > { %p156_p3 = scmp.ne.s32.totalorder %s2262_s19, %s2258_s18  ;;  %p157_p4 = scmp.eq.s32.totalorder %s1690_s23, 1 }
   0x8   : > { %s2355_s27 = scalar_select %p138_p1, %s2266_s20, %s140_s25  }
   0x9   : > { %p2357_p5 = por %p151_p2, %p150_p0  ;;  %p2361_p6 = por %p157_p4, %p156_p3 }
   0xa   : > { %p1693_p7 = scmp.ge.s32.totalorder %s2270_s21, 1  ;;  %p202_p8 = scmp.lt.s32.totalorder %s2270_s21, 3 }
   0xc   : > { %p203_p9 = pnand %p1693_p7, %p202_p8 }
   0xd   : > { %v260_v0 = vld [vmem:[%s2890_s2] sm:$0xff] (!%p203_p9)  ;;  %v261_v1 = vld [vmem:[%s2890_s2 + $0x8] sm:$0xff] (!%p203_p9)  ;;  %v262_v2 = vld [vmem:[%s2890_s2 + $0x10] sm:$0xff] (!%p203_p9)  ;;  %vm268_vm0 = vcmask (!%p203_p9), 261120   ;;  %s1695_s11 = sshll.u32 (!%p203_p9), %s2340_s22, 2  ;;  %v2272_v24 = vmov (!%p203_p9), 1  }
   0xe   : > { %206 = sbr.rel (%p203_p9) target bundleno = 1297 (0x511), region = 40  ;;  %v1932_v3 = vpack.c.bf16 (!%p203_p9), %v261_v1, %v260_v0  ;;  %v263_v4 = vld [vmem:[%s2890_s2 + $0x18] sm:$0xff] (!%p203_p9)  ;;  %v264_v5 = vld [vmem:[%s2891_s3] sm:$0xff] (!%p203_p9)  ;;  %v265_v6 = vld [vmem:[%s2891_s3 + $0x8] sm:$0xff] (!%p203_p9)  ;;  %p236_p10 = scmp.lt.s32.totalorder (!%p203_p9), %s1695_s11, 7  ;;  %2069 = vset.pattern.permute.xlu0 (!%p203_p9), %v2272_v24  ;;  %v2273_v25 = vmov (!%p203_p9), 0  }
   0xf   : > { %v1936_v7 = vpack.c.bf16 (!%p203_p9), %v263_v4, %v262_v2  ;;  %v1940_v8 = vpack.c.bf16 (!%p203_p9), %v265_v6, %v264_v5  ;;  %v248_v9 = vld [vmem:[%s2888_s0] sm:$0xff] (!%p203_p9)  ;;  %v266_v10 = vld [vmem:[%s2891_s3 + $0x10] sm:$0xff] (!%p203_p9)  ;;  %v267_v11 = vld [vmem:[%s2891_s3 + $0x18] sm:$0xff] (!%p203_p9)  ;;  %2068 = vset.pattern.permute.xlu1 (!%p203_p9), %v2273_v25  ;;  %s2275_s13 = smov (!%p203_p9), 64   ;;  %s2276_s14 = smov (!%p203_p9), 63   ;;  %v2278_v40 = vmov (!%p203_p9), 3  }
  0x10   : > { %1933 = vmatprep.subr.bf16.mxu0 (!%p203_p9), %v1932_v3  ;;  %1818 = vmatprep.mubr.msk.f32.mxu0 (!%p203_p9), %vm268_vm0, %v248_v9  ;;  %v1944_v12 = vpack.c.bf16 (!%p203_p9), %v267_v11, %v266_v10  ;;  %v249_v14 = vld [vmem:[%s2888_s0 + $0x8] sm:$0xff] (!%p203_p9)  ;;  %v250_v16 = vld [vmem:[%s2888_s0 + $0x10] sm:$0xff] (!%p203_p9)  ;;  %v251_v18 = vld [vmem:[%s2888_s0 + $0x18] sm:$0xff] (!%p203_p9)  ;;  %s2277_s15 = smov (!%p203_p9), 61   ;;  %v2279_v47 = vmov (!%p203_p9), 2   ;;  %s2280_s16 = smov (!%p203_p9), 112  }
  0x11   : > { %1935 = vmatpush3.bf16.msra.mxu0 (!%p203_p9), %v1932_v3  ;;  %1941 = vmatprep.subr.bf16.mxu1 (!%p203_p9), %v1940_v8  ;;  %v252_v20 = vld [vmem:[%s2888_s0 + $0x20] sm:$0xff] (!%p203_p9)  ;;  %v253_v21 = vld [vmem:[%s2888_s0 + $0x28] sm:$0xff] (!%p203_p9)  ;;  %v254_v22 = vld [vmem:[%s2888_s0 + $0x30] sm:$0xff] (!%p203_p9)  ;;  %vm611_vm4 = vcmask (!%p203_p9), 523264   ;;  %s2282_s30 = smov (!%p203_p9), 96   ;;  %s2283_s6 = smov (!%p203_p9), 16  }
  0x12   : > { %1937 = vmatprep.subr.bf16.mxu0 (!%p203_p9), %v1936_v7  ;;  %1943 = vmatpush3.bf16.msra.mxu1 (!%p203_p9), %v1940_v8  ;;  %v255_v23 = vld [vmem:[%s2888_s0 + $0x38] sm:$0xff] (!%p203_p9)  ;;  %s2284_s7 = smov (!%p203_p9), 32   ;;  %s232_s9 = sand.u32 (!%p203_p9), 1, %s2262_s19  }
  0x13   : > { %1945 = vmatprep.subr.bf16.mxu1 (!%p203_p9), %v1944_v12  ;;  %s1694_s10 = sshll.u32 (!%p203_p9), %s232_s9, 5  ;;  %s2286_s25 = smov (!%p203_p9), [#allocation2]  }
  0x15   : > { %s2901_s11 = smov (!%p236_p10, %s1695_s11), 7  ;;  %1939 = vmatpush3.bf16.msra.mxu0 %v1936_v7 }
  0x16   : > { %s1696_s8 = sshll.u32 %s2901_s11, 3  ;;  %1947 = vmatpush3.bf16.msra.mxu1 %v1944_v12  ;;  %s1698_s17 = sshll.u32 %s2901_s11, 2 }
  0x17   : > { %s239_s12 = scalar_lea.vmem %s2889_s1, %s1696_s8  ;;  %s245_s26 = scalar_lea.vmem %s2892_s4, %s1698_s17 }
  0x18   : > { %v256_v13 = vld [vmem:[%s239_s12] sm:$0xff]  ;;  %v257_v15 = vld [vmem:[%s239_s12 + $0x8] sm:$0xff]  ;;  %v258_v17 = vld [vmem:[%s239_s12 + $0x10] sm:$0xff]  ;;  %1819 = vmatmul.mubr.msk.f32.vlgmr.msra.gmra.mrb[0].mxu0 %vm268_vm0, %v249_v14  ;;  %s2281_s11 = smov 80   ;;  %s2285_s8 = smov 48  }
  0x19   : > { %1838 = vmatprep.mubr.msk.f32.mxu1 %vm268_vm0, %v256_v13  ;;  %1821 = vmatprep.mubr.msk.f32.mxu0 %vm268_vm0, %v250_v16  ;;  %v259_v19 = vld [vmem:[%s239_s12 + $0x18] sm:$0xff]  ;;  %s2274_s12 = smov 62   ;;  %s2847_s17 = scalar_lea.sflag [#allocation3], %s232_s9 }
  0x1a   : > { %1839 = vmatmul.mubr.msk.f32.vlgmr.msra.gmra.mrb[0].mxu1 %vm268_vm0, %v257_v15 }
  0x1b   : > { %1841 = vmatprep.mubr.msk.f32.mxu1 %vm268_vm0, %v258_v17 }
  0x1c   : > { %1822 = vmatmul.mubr.msk.f32.gmra.mrb[2].mxu0 %vm268_vm0, %v251_v18 }
  0x1d   : > { %1824 = vmatprep.mubr.msk.f32.mxu0 %vm268_vm0, %v252_v20 }
  0x1e   : > { %1842 = vmatmul.mubr.msk.f32.gmra.mrb[2].mxu1 %vm268_vm0, %v259_v19 }
  0x20   : > { %1825 = vmatmul.mubr.msk.f32.gmra.mrb[4].mxu0 %vm268_vm0, %v253_v21 }
  0x21   : > { %1827 = vmatprep.mubr.msk.f32.mxu0 %vm268_vm0, %v254_v22 }
  0x24   : > { %1828 = vmatmul.mubr.msk.f32.gmra.mrb[6].mxu0 %vm268_vm0, %v255_v23 }
  0xeb   : > { %v1820_v26 = vpop.f32.mrb[0].mxu0 }
  0xec   : > { %1016 = vrot.lane.b32.xlu0 %v1820_v26, %s2274_s12  ;;  %513 = vrot.lane.b32.xlu1 %v1820_v26, %s2275_s13  ;;  %v359_v27 = vpop.f32.mrb[1].mxu0 }
  0xed   : > { %v1840_v28 = vpop.f32.mrb[0].mxu1  ;;  %v1948_v29 = vpack.c.bf16 %v1820_v26, %v359_v27  ;;  %v2438_v31 = vpack.i.bf16 %v1820_v26, %v359_v27 }
  0xee   : > { %v476_v30 = vpop.f32.mrb[1].mxu1 }
  0xef   : > { %1949 = vmatprep.subr.bf16.mxu0 %v1948_v29  ;;  %v1823_v32 = vpop.f32.mrb[2].mxu0 }
  0xf0   : > { %755 = vrot.lane.b32.xlu1 %v1820_v26, %s2276_s14  ;;  %1951 = vmatpush3.bf16.msra.mxu0 %v1948_v29  ;;  %v2441_v33 = vpop.f32.mrb[3].mxu0 }
  0xf1   : > { %v1843_v34 = vpop.f32.mrb[2].mxu1  ;;  %814 = vperm.xlu0 %2069, %v1840_v28   ;;  %v1952_v35 = vpack.c.bf16 %v1823_v32, %v2441_v33  ;;  %v2447_v37 = vpack.i.bf16 %v1823_v32, %v2441_v33 }
  0xf2   : > { %v2444_v36 = vpop.f32.mrb[3].mxu1 }
  0xf3   : > { %1953 = vmatprep.subr.bf16.mxu0 %v1952_v35  ;;  %v2449_v38 = vpop.f32.mrb[4].mxu0 }
  0xf4   : > { %1277 = vrot.lane.b32.xlu1 %v1820_v26, %s2277_s15  ;;  %1955 = vmatpush3.bf16.msra.mxu0 %v1952_v35  ;;  %v2452_v39 = vpop.f32.mrb[5].mxu0 }
  0xf5   : > { %2071 = vset.pattern.permute.xlu0 %v2278_v40  ;;  %v2456_v41 = vpack.i.bf16 %v2449_v38, %v2452_v39  ;;  %v1956_v42 = vpack.c.bf16 %v2449_v38, %v2452_v39 }
  0xf6   : > { %1336 = vperm.xlu0 %2071, %v1840_v28  }
  0xf7   : > { %v2460_v43 = vpop.f32.mrb[6].mxu0  ;;  %1957 = vmatprep.subr.bf16.mxu0 %v1956_v42 }
  0xf8   : > { %574 = vperm.xlu1 %2068, %v1840_v28   ;;  %1959 = vmatpush3.bf16.msra.mxu0 %v1956_v42  ;;  %v389_v44 = vpop.f32.mrb[7].mxu0 }
  0xf9   : > { %v1960_v45 = vpack.c.bf16 %v2460_v43, %v389_v44  ;;  %v2464_v46 = vpack.i.bf16 %v2460_v43, %v389_v44 }
  0xfa   : > { %511 = vrot.lane.b32.xlu0 %v359_v27, %s2275_s13 }
  0xfb   : > { %2072 = vset.pattern.permute.xlu0 %v2273_v25  ;;  %1961 = vmatprep.subr.bf16.mxu0 %v1960_v45 }
  0xfc   : > { %2070 = vset.pattern.permute.xlu1 %v2279_v47  ;;  %1963 = vmatpush3.bf16.msra.mxu0 %v1960_v45 }
  0xfd   : > { %1075 = vperm.xlu1 %2070, %v1840_v28  }
  0xfe   : > { %753 = vrot.lane.b32.xlu0 %v359_v27, %s2276_s14 }
 0x101   : > { %1275 = vrot.lane.b32.xlu1 %v359_v27, %s2277_s15 }
 0x102   : > { %1014 = vrot.lane.b32.xlu0 %v359_v27, %s2274_s12  ;;  %2073 = vset.pattern.permute.xlu1 %v2272_v24 }
 0x105   : > { %810 = vperm.xlu1 %2073, %v476_v30  }
 0x106   : > { %569 = vperm.xlu0 %2072, %v476_v30  }
 0x109   : > { %2075 = vset.pattern.permute.xlu1 %v2278_v40 }
 0x10a   : > { %2074 = vset.pattern.permute.xlu0 %v2279_v47  ;;  %1332 = vperm.xlu1 %2075, %v476_v30  }
 0x10b   : > { %1071 = vperm.xlu0 %2074, %v476_v30  }
 0x10e   : > { %2077 = vrot.lane.b32.xlu1 %v2438_v31, %s2280_s16 }
 0x10f   : > { %517 = vrot.lane.b32.xlu0 %v1823_v32, %s2275_s13  ;;  %2081 = vset.pattern.permute.xlu1 %v2273_v25 }
 0x110   : > { %2086 = vset.pattern.permute.xlu0 %v2272_v24 }
 0x112   : > { %759 = vrot.lane.b32.xlu1 %v1823_v32, %s2276_s14 }
 0x113   : > { %1020 = vrot.lane.b32.xlu0 %v1823_v32, %s2274_s12 }
 0x116   : > { %1281 = vrot.lane.b32.xlu1 %v1823_v32, %s2277_s15 }
 0x117   : > { %515 = vrot.lane.b32.xlu0 %v2441_v33, %s2275_s13 }
 0x11a   : > { %584 = vperm.xlu1 %2081, %v1843_v34  }
 0x11b   : > { %1018 = vrot.lane.b32.xlu0 %v2441_v33, %s2274_s12 }
 0x11e   : > { %2082 = vset.pattern.permute.xlu1 %v2272_v24 }
 0x11f   : > { %818 = vperm.xlu0 %2086, %v2444_v36   ;;  %822 = vperm.xlu1 %2082, %v1843_v34  }
 0x123   : > { %2088 = vset.pattern.permute.xlu0 %v2278_v40  ;;  %2083 = vset.pattern.permute.xlu1 %v2279_v47 }
 0x124   : > { %1340 = vperm.xlu0 %2088, %v2444_v36   ;;  %1083 = vperm.xlu1 %2083, %v1843_v34  }
 0x128   : > { %2084 = vset.pattern.permute.xlu1 %v2278_v40  ;;  %521 = vrot.lane.b32.xlu0 %v2449_v38, %s2275_s13 }
 0x129   : > { %1344 = vperm.xlu1 %2084, %v1843_v34  }
 0x12c   : > { %1024 = vrot.lane.b32.xlu0 %v2449_v38, %s2274_s12 }
 0x12d   : > { %757 = vrot.lane.b32.xlu1 %v2441_v33, %s2276_s14 }
 0x12e   : > { %2085 = vset.pattern.permute.xlu1 %v2273_v25 }
 0x130   : > { %519 = vrot.lane.b32.xlu0 %v2452_v39, %s2275_s13 }
 0x131   : > { %1279 = vrot.lane.b32.xlu1 %v2441_v33, %s2277_s15 }
 0x134   : > { %1022 = vrot.lane.b32.xlu0 %v2452_v39, %s2274_s12 }
 0x135   : > { %579 = vperm.xlu1 %2085, %v2444_v36  }
 0x138   : > { %2095 = vrot.lane.b32.xlu0 %v2456_v41, %s2280_s16 }
 0x139   : > { %2087 = vset.pattern.permute.xlu1 %v2279_v47 }
 0x13a   : > { %1079 = vperm.xlu1 %2087, %v2444_v36  }
 0x13c   : > { %525 = vrot.lane.b32.xlu0 %v2460_v43, %s2275_s13 }
 0x13e   : > { %2090 = vrot.lane.b32.xlu1 %v2447_v37, %s2280_s16 }
 0x140   : > { %1028 = vrot.lane.b32.xlu0 %v2460_v43, %s2274_s12 }
 0x142   : > { %763 = vrot.lane.b32.xlu1 %v2449_v38, %s2276_s14 }
 0x144   : > { %523 = vrot.lane.b32.xlu0 %v389_v44, %s2275_s13 }
 0x146   : > { %1285 = vrot.lane.b32.xlu1 %v2449_v38, %s2277_s15 }
 0x148   : > { %1026 = vrot.lane.b32.xlu0 %v389_v44, %s2274_s12  ;;  %s234_s12 = scalar_lea.vmem [#allocation2], %s1694_s10 }
 0x149   : > { %s1616_s13 = sshll.u32 %s234_s12, 4  ;;  %s2832_s13 = int_to_ptr.vmem [resolvable:$true] %s1616_s13 }
 0x14a   : > { %761 = vrot.lane.b32.xlu1 %v2452_v39, %s2276_s14  ;;  %s2208_s23 = scalar_lea.vmem %s2832_s13, 512 }
 0x14b   : > { %p2209_p11 = scmp.ne.s32.totalorder %s2832_s13, %s2208_s23 }
 0x14d   : > { %p2210_p12 = pnand %p2209_p11, %p2357_p5 }
 0x14e   : > { %1283 = vrot.lane.b32.xlu1 %v2452_v39, %s2277_s15 }
 0x14f   : > { %p2211_p13 = pneg %p2210_p12 }
 0x152   : > { %767 = vrot.lane.b32.xlu1 %v2460_v43, %s2276_s14 }
 0x156   : > { %1289 = vrot.lane.b32.xlu1 %v2460_v43, %s2277_s15 }
 0x15a   : > { %765 = vrot.lane.b32.xlu1 %v389_v44, %s2276_s14  ;;  %s1732_s14 = sshll.u32 %s2340_s22, 9 }
 0x15e   : > { %1287 = vrot.lane.b32.xlu1 %v389_v44, %s2277_s15  ;;  %v514_v48 = vpop.permute.xlu1 %513  ;;  %v2528_v49 = vpop.permute.xlu0 %1016 }
 0x162   : > { %2100 = vrot.lane.b32.xlu1 %v2464_v46, %s2280_s16  ;;  %v756_v50 = vpop.permute.xlu1 %755  ;;  %s2840_s16 = scalar_lea.hbm %s2893_s5, %s1732_s14 }
 0x166   : > { %v2532_v52 = vpop.permute.xlu1 %1277 }
 0x170   : > { %v2530_v51 = vpop.permute.xlu0 %814 }
 0x175   : > { %v2534_v53 = vpop.permute.xlu0 %1336 }
 0x177   : > { %v2536_v54 = vpop.permute.xlu1 %574 }
 0x179   : > { %v512_v55 = vpop.permute.xlu0 %511 }
 0x17a   : > { %535 = vxpose.xlu0.b32.start [1/8] (short) (narrow) %v512_v55, 8 }
 0x17c   : > { %v2538_v56 = vpop.permute.xlu1 %1075 }
 0x17d   : > { %v754_v57 = vpop.permute.xlu0 %753 }
 0x17e   : > { %536 = vxpose.xlu0.b32.cont [2/8] (short) (narrow) %v514_v48, 8 }
 0x180   : > { %v2540_v58 = vpop.permute.xlu1 %1275 }
 0x181   : > { %v1015_v59 = vpop.permute.xlu0 %1014 }
 0x184   : > { %v2542_v60 = vpop.permute.xlu1 %810 }
 0x185   : > { %v2544_v61 = vpop.permute.xlu0 %569 }
 0x189   : > { %v2546_v62 = vpop.permute.xlu1 %1332 }
 0x18a   : > { %v2548_v63 = vpop.permute.xlu0 %1071 }
 0x18b   : > { %777 = vxpose.xlu1.b32.start [1/8] (short) (narrow) %v754_v57, 8 }
 0x18d   : > { %v2078_v0 = vpop.permute.xlu1 %2077 }
 0x18e   : > { %v2080_v1 = vunpack.i.h.bf16 %v2078_v0  ;;  %v2079_v2 = vunpack.i.l.bf16 %v2078_v0  ;;  %v518_v3 = vpop.permute.xlu0 %517  ;;  %v1734_v0 = vld [vmem:[%s245_s26] sm:$0xff]  }
 0x18f   : > { %778 = vxpose.xlu1.b32.cont [2/8] (short) (narrow) %v756_v50, 8 }
 0x190   : > { %v1964_v4 = vpack.c.bf16 %v2080_v1, %v2079_v2  ;;  %v1741_v2 = vld [vmem:[%s245_s26 + $0x8] sm:$0xff]   ;;  %s2212_s26 = sshll.u32 %s2286_s25, 4  ;;  %s2213_s26 = int_to_ptr.vmem [resolvable:$false] %s2212_s26 }
 0x191   : > { %v760_v5 = vpop.permute.xlu1 %759  ;;  %p2215_p0 = scmp.lt.s32.totalorder %s2832_s13, %s2213_s26 }
 0x192   : > { %v1021_v6 = vpop.permute.xlu0 %1020  ;;  %1965 = vmatprep.subr.bf16.mxu1 %v1964_v4 }
 0x193   : > { %1967 = vmatpush3.bf16.msra.mxu1 %v1964_v4 }
 0x195   : > { %v2550_v7 = vpop.permute.xlu1 %1281 }
 0x196   : > { %v516_v8 = vpop.permute.xlu0 %515 }
 0x197   : > { %537 = vxpose.xlu0.b32.cont [3/8] (short) (narrow) %v516_v8, 8 }
 0x199   : > { %v2552_v9 = vpop.permute.xlu1 %584 }
 0x19a   : > { %v1019_v10 = vpop.permute.xlu0 %1018 }
 0x19b   : > { %538 = vxpose.xlu0.b32.cont [4/8] (short) (narrow) %v518_v3, 8 }
 0x19e   : > { %v2554_v11 = vpop.permute.xlu0 %818  ;;  %v2556_v12 = vpop.permute.xlu1 %822 }
 0x1a3   : > { %v2558_v13 = vpop.permute.xlu0 %1340  ;;  %v2560_v14 = vpop.permute.xlu1 %1083 }
 0x1a7   : > { %v522_v15 = vpop.permute.xlu0 %521 }
 0x1a8   : > { %v2562_v16 = vpop.permute.xlu1 %1344 }
 0x1ab   : > { %v1025_v17 = vpop.permute.xlu0 %1024 }
 0x1ac   : > { %v758_v18 = vpop.permute.xlu1 %757 }
 0x1ad   : > { %779 = vxpose.xlu1.b32.cont [3/8] (short) (narrow) %v758_v18, 8 }
 0x1af   : > { %v520_v19 = vpop.permute.xlu0 %519 }
 0x1b0   : > { %v1280_v20 = vpop.permute.xlu1 %1279  ;;  %539 = vxpose.xlu0.b32.cont [5/8] (short) (narrow) %v520_v19, 8 }
 0x1b1   : > { %780 = vxpose.xlu1.b32.cont [4/8] (short) (narrow) %v760_v5, 8 }
 0x1b3   : > { %v1023_v21 = vpop.permute.xlu0 %1022 }
 0x1b4   : > { %v2564_v22 = vpop.permute.xlu1 %579  ;;  %540 = vxpose.xlu0.b32.cont [6/8] (short) (narrow) %v522_v15, 8  ;;  %v2586_v15 = vunpack.c.l.bf16 %v1741_v2 }
 0x1b7   : > { %v2096_v23 = vpop.permute.xlu0 %2095 }
 0x1b8   : > { %v2098_v27 = vunpack.i.h.bf16 %v2096_v23  ;;  %v2097_v28 = vunpack.i.l.bf16 %v2096_v23 }
 0x1b9   : > { %v2566_v24 = vpop.permute.xlu1 %1079 }
 0x1ba   : > { %v1972_v35 = vpack.c.bf16 %v2098_v27, %v2097_v28 }
 0x1bb   : > { %v526_v25 = vpop.permute.xlu0 %525 }
 0x1bd   : > { %v2091_v26 = vpop.permute.xlu1 %2090 }
 0x1be   : > { %v2093_v29 = vunpack.i.h.bf16 %v2091_v26  ;;  %v2092_v30 = vunpack.i.l.bf16 %v2091_v26 }
 0x1bf   : > { %v1029_v32 = vpop.permute.xlu0 %1028 }
 0x1c0   : > { %v1968_v33 = vpack.c.bf16 %v2093_v29, %v2092_v30 }
 0x1c1   : > { %v764_v34 = vpop.permute.xlu1 %763 }
 0x1c2   : > { %1969 = vmatprep.subr.bf16.mxu1 %v1968_v33 }
 0x1c3   : > { %v524_v36 = vpop.permute.xlu0 %523  ;;  %1971 = vmatpush3.bf16.msra.mxu1 %v1968_v33 }
 0x1c4   : > { %541 = vxpose.xlu0.b32.cont [7/8] (short) (narrow) %v524_v36, 8  ;;  %1973 = vmatprep.subr.bf16.mxu1 %v1972_v35 }
 0x1c5   : > { %v1286_v38 = vpop.permute.xlu1 %1285 }
 0x1c7   : > { %1975 = vmatpush3.bf16.msra.mxu1 %v1972_v35  ;;  %v1027_v55 = vpop.permute.xlu0 %1026 }
 0x1c8   : > { %542 = vxpose.xlu0.b32.end [8/8] (short) (narrow) %v526_v25, 8 }
 0x1c9   : > { %v762_v39 = vpop.permute.xlu1 %761 }
 0x1ca   : > { %781 = vxpose.xlu1.b32.cont [5/8] (short) (narrow) %v762_v39, 8 }
 0x1cc   : > { %1038 = vxpose.xlu0.b32.start [1/8] (short) (narrow) %v1015_v59, 8 }
 0x1cd   : > { %v1284_v40 = vpop.permute.xlu1 %1283 }
 0x1ce   : > { %782 = vxpose.xlu1.b32.cont [6/8] (short) (narrow) %v764_v34, 8 }
 0x1d0   : > { %1039 = vxpose.xlu0.b32.cont [2/8] (short) (narrow) %v2528_v49, 8  ;;  %v587_v49 = vlaneseq }
 0x1d1   : > { %v768_v42 = vpop.permute.xlu1 %767 }
 0x1d2   : > { %v588_v59 = vshrl.u32 %v587_v49, 7 }
 0x1d4   : > { %1040 = vxpose.xlu0.b32.cont [3/8] (short) (narrow) %v1019_v10, 8 }
 0x1d5   : > { %v1290_v43 = vpop.permute.xlu1 %1289 }
 0x1d8   : > { %1041 = vxpose.xlu0.b32.cont [4/8] (short) (narrow) %v1021_v6, 8  ;;  %v2582_v6 = vunpack.c.l.bf16 %v1734_v0 }
 0x1d9   : > { %v766_v44 = vpop.permute.xlu1 %765 }
 0x1da   : > { %783 = vxpose.xlu1.b32.cont [7/8] (short) (narrow) %v766_v44, 8 }
 0x1dc   : > { %1042 = vxpose.xlu0.b32.cont [5/8] (short) (narrow) %v1023_v21, 8 }
 0x1dd   : > { %v1288_v45 = vpop.permute.xlu1 %1287 }
 0x1de   : > { %784 = vxpose.xlu1.b32.end [8/8] (short) (narrow) %v768_v42, 8 }
 0x1e0   : > { %1043 = vxpose.xlu0.b32.cont [6/8] (short) (narrow) %v1025_v17, 8 }
 0x1e1   : > { %v2101_v47 = vpop.permute.xlu1 %2100 }
 0x1e2   : > { %v2103_v48 = vunpack.i.h.bf16 %v2101_v47  ;;  %v2102_v50 = vunpack.i.l.bf16 %v2101_v47  ;;  %1299 = vxpose.xlu1.b32.start [1/8] (short) (narrow) %v2540_v58, 8  ;;  %v2573_v58 = vsub.s32 0, %v588_v59 }
 0x1e4   : > { %v1976_v57 = vpack.c.bf16 %v2103_v48, %v2102_v50  ;;  %1044 = vxpose.xlu0.b32.cont [7/8] (short) (narrow) %v1027_v55, 8 }
 0x1e6   : > { %1300 = vxpose.xlu1.b32.cont [2/8] (short) (narrow) %v2532_v52, 8  ;;  %1977 = vmatprep.subr.bf16.mxu1 %v1976_v57 }
 0x1e7   : > { %1979 = vmatpush3.bf16.msra.mxu1 %v1976_v57 }
 0x1e8   : > { %1045 = vxpose.xlu0.b32.end [8/8] (short) (narrow) %v1029_v32, 8 }
 0x1ea   : > { %1301 = vxpose.xlu1.b32.cont [3/8] (short) (narrow) %v1280_v20, 8 }
 0x1ee   : > { %1302 = vxpose.xlu1.b32.cont [4/8] (short) (narrow) %v2550_v7, 8  ;;  %v2584_v7 = vunpack.c.h.bf16 %v1734_v0 }
 0x1f2   : > { %1303 = vxpose.xlu1.b32.cont [5/8] (short) (narrow) %v1284_v40, 8 }
 0x1f6   : > { %1304 = vxpose.xlu1.b32.cont [6/8] (short) (narrow) %v1286_v38, 8 }
 0x1fa   : > { %1305 = vxpose.xlu1.b32.cont [7/8] (short) (narrow) %v1288_v45, 8  ;;  %v2622_v45 = vunpack.c.h.bf16 %v1741_v2 }
 0x1fe   : > { %1306 = vxpose.xlu1.b32.end [8/8] (short) (narrow) %v1290_v43, 8 }
 0x22c   : > { %v551_v52 = vpop.trf.xlu0 }
 0x22d   : > { %v590_v1 = vrot.slane %v551_v52, %v2573_v58 }
 0x22f   : > { %v591_v3 = vadd.f32 %v590_v1, %v2544_v61  ;;  %v592_v4 = vadd.f32 %v590_v1, %v2536_v54  ;;  %v593_v5 = vadd.f32 %v590_v1, %v2564_v22  ;;  %v594_v32 = vadd.f32 %v590_v1, %v2552_v9 }
 0x231   : > { %vm595_vm1 = vcmp.gt.f32.partialorder %v591_v3, 0.0  ;;  %v599_v8 = vmul.f32 0.2, %v591_v3  ;;  %vm596_vm2 = vcmp.gt.f32.partialorder %v592_v4, 0.0  ;;  %v600_v10 = vmul.f32 0.2, %v592_v4 }
 0x232   : > { %vm597_vm3 = vcmp.gt.f32.partialorder %v593_v5, 0.0  ;;  %v601_v17 = vmul.f32 0.2, %v593_v5  ;;  %v602_v39 = vmul.f32 0.2, %v594_v32  ;;  %vm598_vm8 = vcmp.gt.f32.partialorder %v594_v32, 0.0 }
 0x233   : > { %v603_v18 = vsel %vm595_vm1, %v591_v3, %v599_v8  ;;  %v604_v19 = vsel %vm596_vm2, %v592_v4, %v600_v10 }
 0x234   : > { %v2589_v61 = vadd.f32 %v2582_v6, %v603_v18  ;;  %v2592_v54 = vadd.f32 %v2584_v7, %v604_v19  ;;  %v605_v20 = vsel %vm597_vm3, %v593_v5, %v601_v17  ;;  %v606_v47 = vsel %vm598_vm8, %v594_v32, %v602_v39 }
 0x235   : > { %v2599_v23 = vadd.f32 %v2586_v15, %v605_v20  ;;  %v2630_v49 = vadd.f32 %v2622_v45, %v606_v47  ;;  %vm1584_vm3 = vcmask 130048  }
 0x236   : > { %v612_v21 = vsel %vm611_vm4, %v2589_v61, -inf  ;;  %v615_v22 = vsel %vm611_vm4, %v2592_v54, -inf }
 0x237   : > { %613 = vmax.xlane.f32.xlu0 %v612_v21  ;;  %616 = vmax.xlane.f32.xlu1 %v615_v22  ;;  %v618_v25 = vsel %vm611_vm4, %v2599_v23, -inf  ;;  %v621_v2 = vsel %vm611_vm4, %v2630_v49, -inf }
 0x23b   : > { %619 = vmax.xlane.f32.xlu1 %v618_v25 }
 0x242   : > { %v793_v26 = vpop.trf.xlu1 }
 0x243   : > { %v828_v27 = vrot.slane %v793_v26, %v2573_v58 }
 0x245   : > { %v831_v28 = vadd.f32 %v828_v27, %v2554_v11  ;;  %v829_v29 = vadd.f32 %v828_v27, %v2542_v60  ;;  %v830_v30 = vadd.f32 %v828_v27, %v2530_v51  ;;  %v832_v40 = vadd.f32 %v828_v27, %v2556_v12 }
 0x247   : > { %vm835_vm5 = vcmp.gt.f32.partialorder %v831_v28, 0.0  ;;  %v839_v33 = vmul.f32 0.2, %v831_v28  ;;  %vm833_vm6 = vcmp.gt.f32.partialorder %v829_v29, 0.0  ;;  %v837_v34 = vmul.f32 0.2, %v829_v29 }
 0x248   : > { %vm834_vm7 = vcmp.gt.f32.partialorder %v830_v30, 0.0  ;;  %v838_v35 = vmul.f32 0.2, %v830_v30  ;;  %v840_v48 = vmul.f32 0.2, %v832_v40  ;;  %vm836_vm9 = vcmp.gt.f32.partialorder %v832_v40, 0.0 }
 0x249   : > { %v843_v36 = vsel %vm835_vm5, %v831_v28, %v839_v33  ;;  %v841_v38 = vsel %vm833_vm6, %v829_v29, %v837_v34  ;;  %vm1593_vm5 = vcmask 392192  }
 0x24a   : > { %v2610_v42 = vadd.f32 %v2586_v15, %v843_v36  ;;  %v2613_v60 = vadd.f32 %v2582_v6, %v841_v38  ;;  %v842_v51 = vsel %vm834_vm7, %v830_v30, %v838_v35  ;;  %v844_v52 = vsel %vm836_vm9, %v832_v40, %v840_v48 }
 0x24b   : > { %v2620_v44 = vadd.f32 %v2584_v7, %v842_v51 }
 0x24c   : > { %v1054_v9 = vpop.trf.xlu0  ;;  %v855_v11 = vsel %vm611_vm4, %v2610_v42, -inf  ;;  %v849_v43 = vsel %vm611_vm4, %v2613_v60, -inf }
 0x24d   : > { %v1089_v12 = vrot.slane %v1054_v9, %v2573_v58  ;;  %856 = vmax.xlane.f32.xlu1 %v855_v11  ;;  %850 = vmax.xlane.f32.xlu0 %v849_v43  ;;  %v852_v57 = vsel %vm611_vm4, %v2620_v44, -inf }
 0x24f   : > { %v1090_v50 = vadd.f32 %v1089_v12, %v2548_v63  ;;  %v1091_v55 = vadd.f32 %v1089_v12, %v2538_v56  ;;  %v2638_v56 = vadd.f32 %v2622_v45, %v844_v52  ;;  %v1093_v17 = vadd.f32 %v1089_v12, %v2560_v14 }
 0x250   : > { %v1092_v18 = vadd.f32 %v1089_v12, %v2566_v24 }
 0x251   : > { %853 = vmax.xlane.f32.xlu0 %v852_v57  ;;  %vm1094_vm10 = vcmp.gt.f32.partialorder %v1090_v50, 0.0  ;;  %v1098_v59 = vmul.f32 0.2, %v1090_v50  ;;  %v1099_v0 = vmul.f32 0.2, %v1091_v55  ;;  %vm1095_vm11 = vcmp.gt.f32.partialorder %v1091_v55, 0.0 }
 0x252   : > { %v858_v5 = vsel %vm611_vm4, %v2638_v56, -inf  ;;  %vm1097_vm12 = vcmp.gt.f32.partialorder %v1093_v17, 0.0  ;;  %v1101_v21 = vmul.f32 0.2, %v1093_v17  ;;  %vm1096_vm13 = vcmp.gt.f32.partialorder %v1092_v18, 0.0 }
 0x253   : > { %v1102_v1 = vsel %vm1094_vm10, %v1090_v50, %v1098_v59  ;;  %v1103_v3 = vsel %vm1095_vm11, %v1091_v55, %v1099_v0  ;;  %v1100_v22 = vmul.f32 0.2, %v1092_v18 }
 0x254   : > { %v2635_v63 = vadd.f32 %v2582_v6, %v1102_v1  ;;  %v2645_v8 = vadd.f32 %v2584_v7, %v1103_v3  ;;  %v1105_v24 = vsel %vm1097_vm12, %v1093_v17, %v1101_v21 }
 0x255   : > { %622 = vmax.xlane.f32.xlu0 %v621_v2  ;;  %v1104_v30 = vsel %vm1096_vm13, %v1092_v18, %v1100_v22 }
 0x256   : > { %v1110_v4 = vsel %vm611_vm4, %v2635_v63, -inf  ;;  %v1113_v10 = vsel %vm611_vm4, %v2645_v8, -inf  ;;  %v2670_v36 = vadd.f32 %v2586_v15, %v1104_v30 }
 0x257   : > { %1111 = vmax.xlane.f32.xlu1 %v1110_v4 }
 0x258   : > { %v1116_v39 = vsel %vm611_vm4, %v2670_v36, -inf }
 0x259   : > { %859 = vmax.xlane.f32.xlu0 %v858_v5 }
 0x25d   : > { %1114 = vmax.xlane.f32.xlu0 %v1113_v10 }
 0x262   : > { %v1315_v19 = vpop.trf.xlu1 }
 0x263   : > { %v1350_v20 = vrot.slane %v1315_v19, %v2573_v58 }
 0x265   : > { %v1352_v25 = vadd.f32 %v1350_v20, %v2534_v53  ;;  %v1351_v26 = vadd.f32 %v1350_v20, %v2546_v62  ;;  %v1354_v27 = vadd.f32 %v1350_v20, %v2562_v16  ;;  %v1353_v28 = vadd.f32 %v1350_v20, %v2558_v13 }
 0x266   : > { %v2667_v16 = vadd.f32 %v2622_v45, %v1105_v24 }
 0x267   : > { %vm1356_vm14 = vcmp.gt.f32.partialorder %v1352_v25, 0.0  ;;  %v1360_v29 = vmul.f32 0.2, %v1352_v25  ;;  %vm1355_vm15 = vcmp.gt.f32.partialorder %v1351_v26, 0.0  ;;  %v1359_v14 = vmul.f32 0.2, %v1351_v26 }
 0x268   : > { %v1362_v33 = vmul.f32 0.2, %v1354_v27  ;;  %v1361_v34 = vmul.f32 0.2, %v1353_v28  ;;  %vm1358_vm1 = vcmp.gt.f32.partialorder %v1354_v27, 0.0  ;;  %vm1357_vm2 = vcmp.gt.f32.partialorder %v1353_v28, 0.0 }
 0x269   : > { %v1364_v32 = vsel %vm1356_vm14, %v1352_v25, %v1360_v29  ;;  %v1363_v58 = vsel %vm1355_vm15, %v1351_v26, %v1359_v14 }
 0x26a   : > { %v2657_v35 = vadd.f32 %v2584_v7, %v1364_v32  ;;  %v2660_v53 = vadd.f32 %v2582_v6, %v1363_v58  ;;  %v1366_v7 = vsel %vm1358_vm1, %v1354_v27, %v1362_v33  ;;  %v1365_v38 = vsel %vm1357_vm2, %v1353_v28, %v1361_v34 }
 0x26b   : > { %v1119_v6 = vsel %vm611_vm4, %v2667_v16, -inf  ;;  %v2677_v40 = vadd.f32 %v2622_v45, %v1366_v7  ;;  %v2680_v51 = vadd.f32 %v2586_v15, %v1365_v38 }
 0x26c   : > { %v1374_v62 = vsel %vm611_vm4, %v2657_v35, -inf  ;;  %v1371_v13 = vsel %vm611_vm4, %v2660_v53, -inf }
 0x26d   : > { %1375 = vmax.xlane.f32.xlu0 %v1374_v62  ;;  %1372 = vmax.xlane.f32.xlu1 %v1371_v13  ;;  %v1380_v9 = vsel %vm611_vm4, %v2677_v40, -inf  ;;  %v1377_v11 = vsel %vm611_vm4, %v2680_v51, -inf }
 0x271   : > { %1120 = vmax.xlane.f32.xlu0 %v1119_v6  ;;  %1117 = vmax.xlane.f32.xlu1 %v1116_v39 }
 0x275   : > { %1381 = vmax.xlane.f32.xlu0 %v1380_v9  ;;  %1378 = vmax.xlane.f32.xlu1 %v1377_v11 }
 0x286   : > { %2110 = vrot.lane.b32.xlu1 %v2438_v31, %s2281_s11 }
 0x28a   : > { %2115 = vrot.lane.b32.xlu1 %v2447_v37, %s2282_s30 }
 0x28b   : > { %2105 = vrot.lane.b32.xlu0 %v2438_v31, %s2282_s30 }
 0x28e   : > { %2120 = vrot.lane.b32.xlu1 %v2447_v37, %s2281_s11 }
 0x292   : > { %2125 = vrot.lane.b32.xlu1 %v2456_v41, %s2282_s30 }
 0x296   : > { %2130 = vrot.lane.b32.xlu1 %v2456_v41, %s2281_s11 }
 0x2c4   : > { %v614_v15 = vpop.xlane.xlu0 %613  ;;  %v617_v43 = vpop.xlane.xlu1 %616 }
 0x2c5   : > { %v624_v45 = vsub.f32 %v2589_v61, %v614_v15  ;;  %v625_v12 = vsub.f32 %v2592_v54, %v617_v43 }
 0x2c7   : > { %v628_v47 = vmul.f32 1.442695, %v624_v45  ;;  %v630_v48 = vmul.f32 1.442695, %v625_v12 }
 0x2c8   : > { %v620_v55 = vpop.xlane.xlu1 %619 }
 0x2c9   : > { %2144 = vpow2.f32 %v628_v47  ;;  %v626_v57 = vsub.f32 %v2599_v23, %v620_v55 }
 0x2ca   : > { %2146 = vpow2.f32 %v630_v48 }
 0x2cb   : > { %v632_v1 = vmul.f32 1.442695, %v626_v57 }
 0x2d3   : > { %v2700_v31 = vpop.eup %2144 }
 0x2d4   : > { %v2702_v50 = vpop.eup %2146  ;;  %v636_v37 = vsel %vm611_vm4, %v2700_v31, 0.0 }
 0x2d5   : > { %637 = vadd.xlane.f32.xlu1 %v636_v37  ;;  %v639_v41 = vsel %vm611_vm4, %v2702_v50, 0.0 }
 0x2d6   : > { %640 = vadd.xlane.f32.xlu0 %v639_v41 }
 0x2da   : > { %v851_v61 = vpop.xlane.xlu0 %850  ;;  %v857_v3 = vpop.xlane.xlu1 %856 }
 0x2db   : > { %v861_v54 = vsub.f32 %v2613_v60, %v851_v61  ;;  %v863_v10 = vsub.f32 %v2610_v42, %v857_v3 }
 0x2dd   : > { %v865_v59 = vmul.f32 1.442695, %v861_v54  ;;  %v869_v23 = vmul.f32 1.442695, %v863_v10 }
 0x2de   : > { %v854_v52 = vpop.xlane.xlu0 %853 }
 0x2df   : > { %2148 = vpow2.f32 %v865_v59  ;;  %v862_v0 = vsub.f32 %v2620_v44, %v854_v52 }
 0x2e1   : > { %v867_v2 = vmul.f32 1.442695, %v862_v0 }
 0x2e2   : > { %v623_v4 = vpop.xlane.xlu0 %622 }
 0x2e3   : > { %2150 = vpow2.f32 %v867_v2  ;;  %v627_v5 = vsub.f32 %v2630_v49, %v623_v4 }
 0x2e4   : > { %2152 = vpow2.f32 %v632_v1  ;;  %v1112_v20 = vpop.xlane.xlu1 %1111 }
 0x2e5   : > { %v634_v17 = vmul.f32 1.442695, %v627_v5  ;;  %v1122_v42 = vsub.f32 %v2635_v63, %v1112_v20 }
 0x2e6   : > { %v860_v18 = vpop.xlane.xlu0 %859 }
 0x2e7   : > { %2154 = vpow2.f32 %v634_v17  ;;  %v864_v19 = vsub.f32 %v2638_v56, %v860_v18  ;;  %v1126_v56 = vmul.f32 1.442695, %v1122_v42 }
 0x2e8   : > { %2156 = vpow2.f32 %v869_v23 }
 0x2e9   : > { %v2713_v60 = vpop.eup %2148  ;;  %v871_v25 = vmul.f32 1.442695, %v864_v19 }
 0x2ea   : > { %v1115_v44 = vpop.xlane.xlu0 %1114  ;;  %v873_v21 = vsel %vm611_vm4, %v2713_v60, 0.0 }
 0x2eb   : > { %v1123_v22 = vsub.f32 %v2645_v8, %v1115_v44  ;;  %874 = vadd.xlane.f32.xlu1 %v873_v21 }
 0x2ed   : > { %v2719_v49 = vpop.eup %2150  ;;  %v1128_v26 = vmul.f32 1.442695, %v1123_v22 }
 0x2ee   : > { %v876_v27 = vsel %vm611_vm4, %v2719_v49, 0.0  ;;  %v2724_v28 = vpop.eup %2152 }
 0x2ef   : > { %2158 = vpow2.f32 %v1128_v26  ;;  %877 = vadd.xlane.f32.xlu0 %v876_v27  ;;  %v642_v8 = vsel %vm611_vm4, %v2724_v28, 0.0 }
 0x2f0   : > { %2160 = vpow2.f32 %v871_v25 }
 0x2f1   : > { %v2728_v29 = vpop.eup %2154  ;;  %2162 = vpow2.f32 %v1126_v56 }
 0x2f2   : > { %v645_v63 = vsel %vm611_vm4, %v2728_v29, 0.0  ;;  %v2732_v14 = vpop.eup %2156 }
 0x2f3   : > { %643 = vadd.xlane.f32.xlu0 %v642_v8  ;;  %v879_v33 = vsel %vm611_vm4, %v2732_v14, 0.0 }
 0x2f7   : > { %646 = vadd.xlane.f32.xlu0 %v645_v63 }
 0x2f9   : > { %v2734_v24 = vpop.eup %2158 }
 0x2fa   : > { %v1376_v30 = vpop.xlane.xlu0 %1375  ;;  %v1373_v32 = vpop.xlane.xlu1 %1372  ;;  %v1137_v58 = vsel %vm611_vm4, %v2734_v24, 0.0 }
 0x2fb   : > { %v2740_v34 = vpop.eup %2160  ;;  %v1384_v62 = vsub.f32 %v2657_v35, %v1376_v30  ;;  %v1383_v13 = vsub.f32 %v2660_v53, %v1373_v32  ;;  %1138 = vadd.xlane.f32.xlu1 %v1137_v58  ;;  %880 = vadd.xlane.f32.xlu0 %v879_v33 }
 0x2fc   : > { %v882_v9 = vsel %vm611_vm4, %v2740_v34, 0.0  ;;  %v2746_v11 = vpop.eup %2162 }
 0x2fd   : > { %v1387_v7 = vmul.f32 1.442695, %v1383_v13  ;;  %v1389_v38 = vmul.f32 1.442695, %v1384_v62  ;;  %v1134_v47 = vsel %vm611_vm4, %v2746_v11, 0.0 }
 0x2fe   : > { %v1121_v6 = vpop.xlane.xlu0 %1120  ;;  %v1118_v39 = vpop.xlane.xlu1 %1117 }
 0x2ff   : > { %v1125_v15 = vsub.f32 %v2667_v16, %v1121_v6  ;;  %v1124_v43 = vsub.f32 %v2670_v36, %v1118_v39  ;;  %883 = vadd.xlane.f32.xlu0 %v882_v9  ;;  %2164 = vpow2.f32 %v1387_v7 }
 0x300   : > { %2166 = vpow2.f32 %v1389_v38 }
 0x301   : > { %v1132_v35 = vmul.f32 1.442695, %v1125_v15  ;;  %v1130_v53 = vmul.f32 1.442695, %v1124_v43 }
 0x302   : > { %v1382_v45 = vpop.xlane.xlu0 %1381  ;;  %v1379_v12 = vpop.xlane.xlu1 %1378 }
 0x303   : > { %2168 = vpow2.f32 %v1132_v35  ;;  %v1386_v48 = vsub.f32 %v2677_v40, %v1382_v45  ;;  %v1385_v37 = vsub.f32 %v2680_v51, %v1379_v12  ;;  %1135 = vadd.xlane.f32.xlu0 %v1134_v47 }
 0x304   : > { %2170 = vpow2.f32 %v1130_v53 }
 0x305   : > { %v1391_v41 = vmul.f32 1.442695, %v1385_v37  ;;  %v1393_v16 = vmul.f32 1.442695, %v1386_v48 }
 0x306   : > { %v2106_v36 = vpop.permute.xlu0 %2105  ;;  %v2111_v55 = vpop.permute.xlu1 %2110 }
 0x307   : > { %v2108_v61 = vunpack.i.h.bf16 %v2106_v36  ;;  %v2107_v54 = vunpack.i.l.bf16 %v2106_v36  ;;  %v2113_v57 = vunpack.i.h.bf16 %v2111_v55  ;;  %2172 = vpow2.f32 %v1391_v41 }
 0x308   : > { %v2112_v59 = vunpack.i.l.bf16 %v2111_v55  ;;  %2174 = vpow2.f32 %v1393_v16 }
 0x309   : > { %v1980_v52 = vpack.c.bf16 %v2108_v61, %v2107_v54  ;;  %v2754_v0 = vpop.eup %2164 }
 0x30a   : > { %v2756_v1 = vpack.c.bf16 %v2113_v57, %v2112_v59  ;;  %v1395_v40 = vsel %vm611_vm4, %v2754_v0, 0.0  ;;  %v2760_v51 = vpop.eup %2166  ;;  %v2116_v20 = vpop.permute.xlu1 %2115 }
 0x30b   : > { %1981 = vmatprep.subr.bf16.mxu0 %v1980_v52  ;;  %1396 = vadd.xlane.f32.xlu0 %v1395_v40  ;;  %v1398_v4 = vsel %vm611_vm4, %v2760_v51, 0.0  ;;  %v2118_v27 = vunpack.i.h.bf16 %v2116_v20  ;;  %v2117_v56 = vunpack.i.l.bf16 %v2116_v20 }
 0x30c   : > { %1997 = vmatprep.subr.bf16.mxu1 %v2756_v1 }
 0x30d   : > { %v2763_v2 = vpop.eup %2168  ;;  %v1984_v32 = vpack.c.bf16 %v2118_v27, %v2117_v56 }
 0x30e   : > { %v1143_v3 = vsel %vm611_vm4, %v2763_v2, 0.0  ;;  %v2769_v5 = vpop.eup %2170  ;;  %v2121_v44 = vpop.permute.xlu1 %2120 }
 0x30f   : > { %1144 = vadd.xlane.f32.xlu1 %v1143_v3  ;;  %1399 = vadd.xlane.f32.xlu0 %v1398_v4  ;;  %v1140_v17 = vsel %vm611_vm4, %v2769_v5, 0.0  ;;  %v2123_v6 = vunpack.i.h.bf16 %v2121_v44  ;;  %v2122_v39 = vunpack.i.l.bf16 %v2121_v44 }
 0x311   : > { %v2771_v10 = vpop.eup %2172  ;;  %v2000_v35 = vpack.c.bf16 %v2123_v6, %v2122_v39 }
 0x312   : > { %v1401_v18 = vsel %vm611_vm4, %v2771_v10, 0.0  ;;  %v2777_v23 = vpop.eup %2174  ;;  %v2126_v21 = vpop.permute.xlu1 %2125 }
 0x313   : > { %1141 = vadd.xlane.f32.xlu0 %v1140_v17  ;;  %1402 = vadd.xlane.f32.xlu1 %v1401_v18  ;;  %v1404_v19 = vsel %vm611_vm4, %v2777_v23, 0.0  ;;  %v2127_v58 = vunpack.i.l.bf16 %v2126_v21 }
 0x316   : > { %v2131_v22 = vpop.permute.xlu1 %2130 }
 0x317   : > { %1405 = vadd.xlane.f32.xlu1 %v1404_v19  ;;  %v2133_v53 = vunpack.i.h.bf16 %v2131_v22  ;;  %v2132_v45 = vunpack.i.l.bf16 %v2131_v22 }
 0x319   : > { %v2004_v48 = vpack.c.bf16 %v2133_v53, %v2132_v45 }
 0x328   : > { %2140 = vrot.lane.b32.xlu1 %v2464_v46, %s2281_s11  ;;  %s2214_s11 = scalar_lea.vmem %s2213_s26, 1024 }
 0x329   : > { %2135 = vrot.lane.b32.xlu0 %v2464_v46, %s2282_s30  ;;  %v2128_v46 = vunpack.i.h.bf16 %v2126_v21  ;;  %p2216_p1 = scmp.lt.s32.totalorder %s2214_s11, %s2208_s23 }
 0x32b   : > { %v1988_v33 = vpack.c.bf16 %v2128_v46, %v2127_v58  ;;  %p2217_p2 = por %p2216_p1, %p2215_p0 }
 0x32d   : > { %p2218_p3 = pnand %p2217_p2, %p2211_p13 }
 0x362   : > { %v638_v42 = vpop.xlane.xlu1 %637 }
 0x363   : > { %v641_v25 = vpop.xlane.xlu0 %640  ;;  %2176 = vrcp.f32 %v638_v42 }
 0x364   : > { %2178 = vrcp.f32 %v641_v25 }
 0x36d   : > { %v2177_v26 = vpop.eup %2176 }
 0x36e   : > { %v2179_v8 = vpop.eup %2178  ;;  %v652_v63 = vmul.f32 %v2177_v26, %v2700_v31 }
 0x36f   : > { %v653_v30 = vmul.f32 %v2179_v8, %v2702_v50 }
 0x370   : > { %1860 = vmatprep.mubr.msk.f32.mxu0 %vm611_vm4, %v652_v63 }
 0x371   : > { %1861 = vmatmul.mubr.msk.f32.vlgmr.msra.gmra.mrb[8].mxu0 %vm611_vm4, %v653_v30 }
 0x372   : > { %1983 = vmatpush3.bf16.msra.mxu0 %v1980_v52 }
 0x373   : > { %1985 = vmatprep.subr.bf16.mxu0 %v1984_v32 }
 0x376   : > { %1987 = vmatpush3.bf16.msra.mxu0 %v1984_v32 }
 0x377   : > { %1989 = vmatprep.subr.bf16.mxu0 %v1988_v33 }
 0x378   : > { %v875_v62 = vpop.xlane.xlu1 %874 }
 0x379   : > { %2180 = vrcp.f32 %v875_v62 }
 0x37a   : > { %1991 = vmatpush3.bf16.msra.mxu0 %v1988_v33 }
 0x37c   : > { %v878_v13 = vpop.xlane.xlu0 %877 }
 0x37d   : > { %2182 = vrcp.f32 %v878_v13 }
 0x380   : > { %v644_v31 = vpop.xlane.xlu0 %643 }
 0x381   : > { %2184 = vrcp.f32 %v644_v31 }
 0x383   : > { %v2181_v50 = vpop.eup %2180 }
 0x384   : > { %v647_v7 = vpop.xlane.xlu0 %646  ;;  %v889_v38 = vmul.f32 %v2181_v50, %v2713_v60 }
 0x385   : > { %2186 = vrcp.f32 %v647_v7 }
 0x386   : > { %1882 = vmatprep.mubr.msk.f32.mxu1 %vm611_vm4, %v889_v38 }
 0x387   : > { %v2183_v9 = vpop.eup %2182 }
 0x388   : > { %v890_v15 = vmul.f32 %v2183_v9, %v2719_v49  ;;  %v881_v43 = vpop.xlane.xlu0 %880  ;;  %v1139_v55 = vpop.xlane.xlu1 %1138 }
 0x389   : > { %2188 = vrcp.f32 %v881_v43 }
 0x38a   : > { %1883 = vmatmul.mubr.msk.f32.vlgmr.msra.gmra.mrb[4].mxu1 %vm611_vm4, %v890_v15 }
 0x38b   : > { %v2185_v12 = vpop.eup %2184  ;;  %1999 = vmatpush3.bf16.msra.mxu1 %v2756_v1 }
 0x38c   : > { %2001 = vmatprep.subr.bf16.mxu1 %v2000_v35  ;;  %v884_v60 = vpop.xlane.xlu0 %883  ;;  %v654_v47 = vmul.f32 %v2185_v12, %v2724_v28 }
 0x38d   : > { %2190 = vrcp.f32 %v884_v60 }
 0x38e   : > { %1863 = vmatprep.mubr.msk.f32.mxu0 %vm611_vm4, %v654_v47 }
 0x38f   : > { %v2187_v37 = vpop.eup %2186  ;;  %2003 = vmatpush3.bf16.msra.mxu1 %v2000_v35 }
 0x390   : > { %2005 = vmatprep.subr.bf16.mxu1 %v2004_v48  ;;  %v1136_v49 = vpop.xlane.xlu0 %1135  ;;  %v655_v41 = vmul.f32 %v2187_v37, %v2728_v29 }
 0x391   : > { %2192 = vrcp.f32 %v1136_v49 }
 0x392   : > { %1864 = vmatmul.mubr.msk.f32.gmra.mrb[10].mxu0 %vm611_vm4, %v655_v41 }
 0x393   : > { %v2189_v16 = vpop.eup %2188  ;;  %2007 = vmatpush3.bf16.msra.mxu1 %v2004_v48 }
 0x394   : > { %v891_v36 = vmul.f32 %v2189_v16, %v2732_v14 }
 0x396   : > { %1885 = vmatprep.mubr.msk.f32.mxu1 %vm611_vm4, %v891_v36 }
 0x397   : > { %v2191_v28 = vpop.eup %2190 }
 0x398   : > { %v892_v61 = vmul.f32 %v2191_v28, %v2740_v34  ;;  %v1397_v54 = vpop.xlane.xlu0 %1396 }
 0x399   : > { %2194 = vrcp.f32 %v1397_v54 }
 0x39a   : > { %1886 = vmatmul.mubr.msk.f32.gmra.mrb[6].mxu1 %vm611_vm4, %v892_v61  ;;  %2196 = vrcp.f32 %v1139_v55 }
 0x39b   : > { %v2193_v57 = vpop.eup %2192 }
 0x39c   : > { %v1145_v59 = vpop.xlane.xlu1 %1144  ;;  %v1150_v29 = vmul.f32 %v2193_v57, %v2746_v11  ;;  %v1400_v52 = vpop.xlane.xlu0 %1399 }
 0x39d   : > { %2198 = vrcp.f32 %v1145_v59 }
 0x39e   : > { %1904 = vmatprep.mubr.msk.f32.mxu0 %vm611_vm4, %v1150_v29 }
 0x3a0   : > { %v1142_v14 = vpop.xlane.xlu0 %1141  ;;  %v1403_v1 = vpop.xlane.xlu1 %1402 }
 0x3a1   : > { %2200 = vrcp.f32 %v1142_v14 }
 0x3a2   : > { %2202 = vrcp.f32 %v1400_v52 }
 0x3a3   : > { %v2195_v40 = vpop.eup %2194  ;;  %2204 = vrcp.f32 %v1403_v1 }
 0x3a4   : > { %v2136_v34 = vpop.permute.xlu0 %2135  ;;  %v1406_v3 = vpop.xlane.xlu1 %1405  ;;  %v1411_v4 = vmul.f32 %v2195_v40, %v2754_v0 }
 0x3a5   : > { %v2138_v17 = vunpack.i.h.bf16 %v2136_v34  ;;  %v2137_v18 = vunpack.i.l.bf16 %v2136_v34  ;;  %2206 = vrcp.f32 %v1406_v3  ;;  %v2197_v19 = vpop.eup %2196 }
 0x3a6   : > { %1926 = vmatprep.mubr.msk.f32.mxu1 %vm611_vm4, %v1411_v4  ;;  %v1151_v25 = vmul.f32 %v2197_v19, %v2734_v24 }
 0x3a7   : > { %v1992_v11 = vpack.c.bf16 %v2138_v17, %v2137_v18  ;;  %v2199_v22 = vpop.eup %2198 }
 0x3a8   : > { %v2141_v20 = vpop.permute.xlu1 %2140  ;;  %v1153_v63 = vmul.f32 %v2199_v22, %v2763_v2 }
 0x3a9   : > { %v2143_v44 = vunpack.i.h.bf16 %v2141_v20  ;;  %v2142_v21 = vunpack.i.l.bf16 %v2141_v20  ;;  %1993 = vmatprep.subr.bf16.mxu0 %v1992_v11 }
 0x3aa   : > { %1995 = vmatpush3.bf16.msra.mxu0 %v1992_v11 }
 0x3ab   : > { %v2201_v42 = vpop.eup %2200  ;;  %v2008_v26 = vpack.c.bf16 %v2143_v44, %v2142_v21 }
 0x3ac   : > { %v2203_v27 = vpop.eup %2202  ;;  %v1152_v0 = vmul.f32 %v2201_v42, %v2769_v5 }
 0x3ad   : > { %v2205_v56 = vpop.eup %2204  ;;  %1905 = vmatmul.mubr.msk.f32.vlgmr.msra.gmra.mrb[12].mxu0 %vm611_vm4, %v1151_v25  ;;  %2009 = vmatprep.subr.bf16.mxu1 %v2008_v26  ;;  %v1412_v8 = vmul.f32 %v2203_v27, %v2760_v51 }
 0x3ae   : > { %1907 = vmatprep.mubr.msk.f32.mxu0 %vm611_vm4, %v1152_v0  ;;  %2011 = vmatpush3.bf16.msra.mxu1 %v2008_v26  ;;  %v1413_v32 = vmul.f32 %v2205_v56, %v2771_v10 }
 0x3af   : > { %v2207_v30 = vpop.eup %2206 }
 0x3b0   : > { %v1414_v24 = vmul.f32 %v2207_v30, %v2777_v23 }
 0x3b1   : > { %1908 = vmatmul.mubr.msk.f32.gmra.mrb[14].mxu0 %vm611_vm4, %v1153_v63  ;;  %1927 = vmatmul.mubr.msk.f32.vlgmr.msra.gmra.mrb[8].mxu1 %vm611_vm4, %v1412_v8 }
 0x3b2   : > { %1929 = vmatprep.mubr.msk.f32.mxu1 %vm611_vm4, %v1413_v32 }
 0x3b5   : > { %1930 = vmatmul.mubr.msk.f32.gmra.mrb[10].mxu1 %vm611_vm4, %v1414_v24 }
 0x444   : > { %v1862_v5 = vpop.f32.mrb[8].mxu0 }
 0x445   : > { %v734_v46 = vpop.f32.mrb[9].mxu0 }
 0x45d   : > { %v1884_v58 = vpop.f32.mrb[4].mxu1 }
 0x45e   : > { %1542 = vrot.lane.b32.xlu1 %v1884_v58, %s2283_s6  ;;  %v995_v51 = vpop.f32.mrb[5].mxu1 }
 0x45f   : > { %1540 = vrot.lane.b32.xlu0 %v995_v51, %s2283_s6 }
 0x465   : > { %v1865_v2 = vpop.f32.mrb[10].mxu0 }
 0x466   : > { %v744_v33 = vpop.f32.mrb[11].mxu0 }
 0x46d   : > { %v1887_v10 = vpop.f32.mrb[6].mxu1 }
 0x46e   : > { %1546 = vrot.lane.b32.xlu1 %v1887_v10, %s2283_s6  ;;  %v1005_v62 = vpop.f32.mrb[7].mxu1 }
 0x46f   : > { %1544 = vrot.lane.b32.xlu0 %v1005_v62, %s2283_s6 }
 0x480   : > { %v1906_v13 = vpop.f32.mrb[12].mxu0 }
 0x481   : > { %v1256_v31 = vpop.f32.mrb[13].mxu0  ;;  %1558 = vrot.lane.b32.xlu1 %v1906_v13, %s2284_s7 }
 0x482   : > { %1556 = vrot.lane.b32.xlu0 %v1256_v31, %s2284_s7 }
 0x484   : > { %v1909_v23 = vpop.f32.mrb[14].mxu0  ;;  %v1928_v50 = vpop.f32.mrb[8].mxu1 }
 0x485   : > { %v1266_v7 = vpop.f32.mrb[15].mxu0  ;;  %1574 = vrot.lane.b32.xlu1 %v1928_v50, %s2285_s8  ;;  %v1517_v38 = vpop.f32.mrb[9].mxu1 }
 0x486   : > { %1572 = vrot.lane.b32.xlu0 %v1517_v38, %s2285_s8 }
 0x488   : > { %v1931_v6 = vpop.f32.mrb[10].mxu1 }
 0x489   : > { %1562 = vrot.lane.b32.xlu1 %v1909_v23, %s2284_s7  ;;  %v1527_v39 = vpop.f32.mrb[11].mxu1 }
 0x48a   : > { %1560 = vrot.lane.b32.xlu0 %v1266_v7, %s2284_s7 }
 0x48d   : > { %1578 = vrot.lane.b32.xlu1 %v1931_v6, %s2285_s8 }
 0x48e   : > { %1576 = vrot.lane.b32.xlu0 %v1527_v39, %s2285_s8 }
 0x4d0   : > { %v1543_v9 = vpop.permute.xlu1 %1542 }
 0x4d1   : > { %v1541_v15 = vpop.permute.xlu0 %1540  ;;  %v1586_v12 = vsel %vm1584_vm3, %v1862_v5, %v1543_v9 }
 0x4d2   : > { %v1585_v60 = vsel %vm1584_vm3, %v734_v46, %v1541_v15 }
 0x4e0   : > { %v1547_v43 = vpop.permute.xlu1 %1546 }
 0x4e1   : > { %v1545_v35 = vpop.permute.xlu0 %1544  ;;  %v1588_v55 = vsel %vm1584_vm3, %v1865_v2, %v1547_v43 }
 0x4e2   : > { %v1587_v61 = vsel %vm1584_vm3, %v744_v33, %v1545_v35 }
 0x4f3   : > { %v1559_v53 = vpop.permute.xlu1 %1558 }
 0x4f4   : > { %v1557_v45 = vpop.permute.xlu0 %1556  ;;  %v1590_v47 = vsel %vm268_vm0, %v1586_v12, %v1559_v53 }
 0x4f5   : > { %v1589_v37 = vsel %vm268_vm0, %v1585_v60, %v1557_v45 }
 0x4f7   : > { %v1575_v48 = vpop.permute.xlu1 %1574 }
 0x4f8   : > { %v1595_v49 = vsel %vm1593_vm5, %v1590_v47, %v1575_v48  ;;  %v1573_v41 = vpop.permute.xlu0 %1572 }
 0x4f9   : > { %1599 = vst.msk [vmem:[%s234_s12 + $0x8] sm:$0xff] %vm611_vm4, %v1595_v49  ;;  %v1594_v16 = vsel %vm1593_vm5, %v1589_v37, %v1573_v41 }
 0x4fa   : > { %1598 = vst.msk [vmem:[%s234_s12] sm:$0xff] %vm611_vm4, %v1594_v16 }
 0x4fb   : > { %v1563_v36 = vpop.permute.xlu1 %1562 }
 0x4fc   : > { %v1561_v28 = vpop.permute.xlu0 %1560  ;;  %v1592_v54 = vsel %vm268_vm0, %v1588_v55, %v1563_v36 }
 0x4fd   : > { %v1591_v59 = vsel %vm268_vm0, %v1587_v61, %v1561_v28 }
 0x4ff   : > { %v1579_v57 = vpop.permute.xlu1 %1578 }
 0x500   : > { %v1597_v29 = vsel %vm1593_vm5, %v1592_v54, %v1579_v57  ;;  %v1577_v52 = vpop.permute.xlu0 %1576 }
 0x501   : > { %1601 = vst.msk [vmem:[%s234_s12 + $0x18] sm:$0xff] %vm611_vm4, %v1597_v29  ;;  %v1596_v14 = vsel %vm1593_vm5, %v1591_v59, %v1577_v52 }
 0x502   : > { %1600 = vst.msk [vmem:[%s234_s12 + $0x10] sm:$0xff] %vm611_vm4, %v1596_v14 }
 0x503   : > { %2221 = shalt.err (!%p2218_p3)
}
 0x504   : > { %s2222_s30 = scalar_lea.hbm %s2840_s16, 512  ;;  %s2226_s8 = scalar_lea.hbm %s2893_s5, 1024 }
 0x505   : > { %p2223_p4 = scmp.ne.s32.totalorder %s2840_s16, %s2222_s30  ;;  %p2227_p9 = scmp.lt.u32.totalorder %s2840_s16, %s2893_s5 }
 0x506   : > { %p2228_p10 = scmp.lt.u32.totalorder %s2226_s8, %s2222_s30  ;;  %p2230_p12 = scmp.lt.u32.totalorder %s2222_s30, %s2840_s16 }
 0x507   : > { %p2224_p7 = pnand %p2223_p4, %p2357_p5 }
 0x508   : > { %p2229_p11 = por %p2228_p10, %p2227_p9 }
 0x509   : > { %p2225_p8 = pneg %p2224_p7 }
 0x50a   : > { %p2231_p13 = por %p2230_p12, %p2229_p11 }
 0x50c   : > { %p2232_p0 = pnand %p2231_p13, %p2225_p8 }
 0x50e   : > { %2235 = shalt.err (!%p2232_p0)
}
 0x50f   : > { %s2287_s12 = smov 128   ;;  %s2288_s14 = smov 8  }
 0x510   : > { %2012 = dma.vmem_to_hbm [thread:$0]  (%p2357_p5), %s2832_s13, 512, %s2840_s16, %s2847_s17, %s2287_s12, %s2287_s12, %s2288_s14  }
 0x511 PF: > { %p2018_p1 = scmp.ge.s32.totalorder %s2270_s21, 2  ;;  %s1631_s15 = sand.u32 1, %s2258_s18  }
 0x512   : > { %s1632_s22 = scalar_lea.sflag [#allocation3], %s1631_s15 }
 0x513   : > { %p2015_p2 = pnand %p2018_p1, %p2361_p6 }
 0x515   : > { %2253 = dma.done.wait (!%p2015_p2), %s1632_s22, 512  }
 0x516   : > { %2255 = vsyncadd (!%p2015_p2), %s1632_s22, 4294966784  ;;  %p15_p3 = scmp.ge.s32.totalorder %s2344_s24, 4   ;;  %s2896_s18 = smov %s2262_s19 }
 0x517   : > { %s2897_s19 = smov %s2266_s20  ;;  %s2898_s20 = smov %s2355_s27 }
 0x518   : > { %s2899_s21 = smov %s2344_s24  ;;  %17 = sbr.rel (!%p15_p3) target bundleno = 3 (0x3), region = 78 }
 0x51f   :  { %1637 = vsyncpa [#allocation3], 1 }
 0x520   :  { %1639 = vsyncpa [#allocation3 + $0x1], 1 }

</bundles_post_ra>
